<compile_context>
chip_gen: v6e
topology: v6e:2x2x1
jax: 0.10.0
libtpu: 0.0.40
codegen_flags: <defaults>
</compile_context>

<pallas_src>
import functools

import jax
import jax.numpy as jnp
from jax import lax
from jax.experimental import pallas as pl
from jax.experimental.pallas import tpu as pltpu

_EPS = 1e-5


def _awl2_kernel(log_vars_ref,    # SMEM (2,)      f32  -- nn.Parameter log_vars
                 seg_logits_ref,  # VMEM (C, Ts)   bf16 (batch dim squeezed)
                 seg_labels_ref,  # VMEM (1, Ts)   i32  (batch dim squeezed)
                 seg_w_ref,       # VMEM (C, 1)    f32  per-class seg weights
                 idh_logits_ref,  # VMEM (B, K)    f32
                 idh_onehot_ref,  # VMEM (B, K)    f32
                 idh_w_ref,       # VMEM (1, K)    f32  per-class CE weights
                 scalars_ref,     # VMEM (8, 128)  f32  out: loss/seg/idh/miou/std1/std2
                 dice_ref,        # VMEM (C, 128)  f32  out: per-class dice (lane-bcast)
                 inter_acc,       # VMEM scratch (C, 1) f32
                 psum_acc,        # VMEM scratch (C, 1) f32
                 tsum_acc):       # VMEM scratch (C, 1) f32
    b = pl.program_id(0)
    s = pl.program_id(1)
    nb = pl.num_programs(0)
    ns = pl.num_programs(1)
    C, Ts = seg_logits_ref.shape

    # ---------------- init accumulators on the very first grid step ----------
    @pl.when(jnp.logical_and(b == 0, s == 0))
    def _init():
        inter_acc[...] = jnp.zeros_like(inter_acc)
        psum_acc[...] = jnp.zeros_like(psum_acc)
        tsum_acc[...] = jnp.zeros_like(tsum_acc)

    # ---------------- loss_fn[0] partial: channel softmax + dice sums --------
    x = seg_logits_ref[...].astype(jnp.float32)              # (C, Ts), f32 accum
    lbl = seg_labels_ref[...]                                 # (1, Ts) int32
    cls = lax.broadcasted_iota(jnp.int32, (C, Ts), 0)
    t = (cls == lbl).astype(jnp.float32)                      # in-kernel one-hot mask

    m = jnp.max(x, axis=0, keepdims=True)                     # (1, Ts)
    e = jnp.exp(x - m)                                        # (C, Ts)   (EUP)
    inv = pl.reciprocal(jnp.sum(e, axis=0, keepdims=True), approx=True)
    p = e * inv                                               # softmax probs

    inter_acc[...] += jnp.sum(p * t, axis=1, keepdims=True)   # (C, 1)
    psum_acc[...] += jnp.sum(p, axis=1, keepdims=True)
    tsum_acc[...] += jnp.sum(t, axis=1, keepdims=True)

    # ---------------- finalize everything on the last grid step --------------
    @pl.when(jnp.logical_and(b == nb - 1, s == ns - 1))
    def _finalize():
        inter = inter_acc[...]
        psum = psum_acc[...]
        tsum = tsum_acc[...]
        dice = (2.0 * inter + _EPS) / (psum + tsum + _EPS)             # (C, 1)
        iou = (inter + _EPS) / (psum + tsum - inter + _EPS)            # (C, 1) soft IoU
        miou = jnp.mean(iou, keepdims=True)                            # (1, 1)
        seg_loss = jnp.sum(seg_w_ref[...] * (1.0 - dice), keepdims=True)

        # loss_fn[1]: class-weighted cross-entropy (IDH)
        xl = idh_logits_ref[...]                                       # (B, K)
        oh = idh_onehot_ref[...]
        w_cls = idh_w_ref[...]                                         # (1, K)
        mm = jnp.max(xl, axis=1, keepdims=True)
        ee = jnp.exp(xl - mm)
        logp = xl - mm - jnp.log(jnp.sum(ee, axis=1, keepdims=True))   # (B, K)
        nll = -jnp.sum(oh * logp, axis=1, keepdims=True)               # (B, 1)
        ws = jnp.sum(oh * w_cls, axis=1, keepdims=True)                # (B, 1)
        idh_loss = jnp.sum(ws * nll, keepdims=True) / jnp.sum(ws, keepdims=True)

        # uncertainty-weighted combination (matches the PyTorch forward exactly)
        lv0 = jnp.full((1, 1), log_vars_ref[0], jnp.float32)
        lv1 = jnp.full((1, 1), log_vars_ref[1], jnp.float32)
        std1 = jnp.exp(0.5 * lv0)                                      # = sqrt(exp(lv))
        std2 = jnp.exp(0.5 * lv1)
        seg_loss_1 = 0.5 * jnp.exp(-lv0) * seg_loss + lv0              # sum(-1) of scalar
        idh_loss_1 = 0.5 * jnp.exp(-lv1) * idh_loss + lv1
        loss = seg_loss_1 + idh_loss_1                                 # mean of scalar

        # single lane-dense output slab: row r, all 128 lanes = value r
        row = lax.broadcasted_iota(jnp.int32, (8, 128), 0)
        slab = (jnp.where(row == 0, loss, 0.0)
                + jnp.where(row == 1, seg_loss, 0.0)
                + jnp.where(row == 2, idh_loss, 0.0)
                + jnp.where(row == 3, miou, 0.0)
                + jnp.where(row == 4, std1, 0.0)
                + jnp.where(row == 5, std2, 0.0))
        scalars_ref[...] = slab
        dice_ref[...] = jnp.broadcast_to(dice, dice_ref.shape)


def _pick_spatial_tile(S, max_tile=8192):
    """Largest multiple of 128 that divides S, capped at max_tile (fallback: S)."""
    if S % 128 != 0:
        return S
    best = 128
    t = 256
    cap = min(S, max_tile)
    while t <= cap:
        if S % t == 0:
            best = t
        t += 128
    return best


@functools.partial(jax.jit, static_argnames="spatial_tile")
def automatic_weighted_loss2(log_vars, seg_logits, seg_labels, seg_class_w,
                             idh_logits, idh_labels, idh_class_w,
                             *, spatial_tile=8192):
    """Forward pass of AutomaticWeightedLoss2.
    Returns (loss, seg_loss, idh_loss, dice_per_class, miou, std_1, std_2)."""
    B, C, H, W = seg_logits.shape
    S = H * W
    K = idh_logits.shape[1]
    Ts = _pick_spatial_tile(S, spatial_tile)
    ns = S // Ts

    # HBM-side inputs: bf16 logits, int32 labels (no materialized one-hot).
    seg_logits_b = seg_logits.reshape(B, C, S).astype(jnp.bfloat16)
    seg_labels_i = seg_labels.reshape(B, 1, S).astype(jnp.int32)
    idh_logits_f = idh_logits.astype(jnp.float32)
    idh_onehot = jax.nn.one_hot(idh_labels, K, dtype=jnp.float32)      # tiny (B, K)
    seg_w = seg_class_w.reshape(C, 1).astype(jnp.float32)
    idh_w = idh_class_w.reshape(1, K).astype(jnp.float32)

    out_shapes = (
        jax.ShapeDtypeStruct((8, 128), jnp.float32),   # coalesced scalar slab
        jax.ShapeDtypeStruct((C, 128), jnp.float32),   # per-class dice (lane-bcast)
    )

    in_specs = [
        pl.BlockSpec(memory_space=pltpu.MemorySpace.SMEM),                  # log_vars
        pl.BlockSpec((pl.Squeezed(), C, Ts), lambda b, s: (b, 0, s)),       # seg logits
        pl.BlockSpec((pl.Squeezed(), 1, Ts), lambda b, s: (b, 0, s)),       # seg labels
        pl.BlockSpec((C, 1), lambda b, s: (0, 0)),                          # seg weights
        pl.BlockSpec((B, K), lambda b, s: (0, 0)),                          # idh logits
        pl.BlockSpec((B, K), lambda b, s: (0, 0)),                          # idh one-hot
        pl.BlockSpec((1, K), lambda b, s: (0, 0)),                          # idh weights
    ]
    out_specs = (
        pl.BlockSpec((8, 128), lambda b, s: (0, 0)),
        pl.BlockSpec((C, 128), lambda b, s: (0, 0)),
    )

    scalars, dice = pl.pallas_call(
        _awl2_kernel,
        out_shape=out_shapes,
        grid=(B, ns),
        in_specs=in_specs,
        out_specs=out_specs,
        scratch_shapes=[pltpu.VMEM((C, 1), jnp.float32),
                        pltpu.VMEM((C, 1), jnp.float32),
                        pltpu.VMEM((C, 1), jnp.float32)],
        compiler_params=pltpu.CompilerParams(
            dimension_semantics=("arbitrary", "arbitrary"),
            vmem_limit_bytes=32 * 1024 * 1024),
    )(log_vars.astype(jnp.float32), seg_logits_b, seg_labels_i, seg_w,
      idh_logits_f, idh_onehot, idh_w)

    loss = scalars[0, 0]
    seg_loss = scalars[1, 0]
    idh_loss = scalars[2, 0]
    miou = scalars[3, 0]
    std1 = scalars[4, 0]
    std2 = scalars[5, 0]
    return loss, seg_loss, idh_loss, dice[:, 0], miou, std1, std2


if __name__ == "__main__":
    key = jax.random.PRNGKey(0)
    k1, k2, k3, k4 = jax.random.split(key, 4)

    B, C, H, W, K = 2, 4, 16, 16, 2
    seg_logits = jax.random.normal(k1, (B, C, H, W), jnp.float32)    # NCHW, like PyTorch
    seg_labels = jax.random.randint(k2, (B, H, W), 0, C)
    idh_logits = jax.random.normal(k3, (B, K), jnp.float32)
    idh_labels = jax.random.randint(k4, (B,), 0, K)
    seg_class_w = jnp.ones((C,), jnp.float32)
    idh_class_w = jnp.ones((K,), jnp.float32)

    # nn.Parameter(torch.tensor((0.0, 0.0))) -> deterministic zero init.
    log_vars = jnp.zeros((2,), jnp.float32)

    result = automatic_weighted_loss2(log_vars, seg_logits, seg_labels, seg_class_w,
                                      idh_logits, idh_labels, idh_class_w)
    jax.block_until_ready(result)
    print("KERNEL_OK")
</pallas_src>

<mosaic_0001>
module attributes {stable_mosaic.version = 11 : i64} {
  func.func @_awl2_kernel(%arg0: i32, %arg1: i32, %arg2: memref<2xf32, #tpu.memory_space<smem>>, %arg3: memref<1x4x256xbf16, #tpu.memory_space<vmem>>, %arg4: memref<1x1x256xi32, #tpu.memory_space<vmem>>, %arg5: memref<4x1xf32, #tpu.memory_space<vmem>>, %arg6: memref<2x2xf32, #tpu.memory_space<vmem>>, %arg7: memref<2x2xf32, #tpu.memory_space<vmem>>, %arg8: memref<1x2xf32, #tpu.memory_space<vmem>>, %arg9: memref<8x128xf32, #tpu.memory_space<vmem>>, %arg10: memref<4x128xf32, #tpu.memory_space<vmem>>, %arg11: memref<4x1xf32, #tpu.memory_space<vmem>>, %arg12: memref<4x1xf32, #tpu.memory_space<vmem>>, %arg13: memref<4x1xf32, #tpu.memory_space<vmem>>) attributes {dimension_semantics = [#tpu.dimension_semantics<arbitrary>, #tpu.dimension_semantics<arbitrary>], iteration_bounds = array<i64: 2, 1>, scalar_prefetch = 0 : i64, scratch_operands = 3 : i64, tpu.core_type = #tpu.core_type<tc>, window_params = [{transform_indices = @transform_0, window_bounds = array<i64: 2>}, {transform_indices = @transform_1, window_bounds = array<i64: 1, 4, 256>}, {transform_indices = @transform_2, window_bounds = array<i64: 1, 1, 256>}, {pipeline_mode = #tpu.pipeline_mode<synchronous>, transform_indices = @transform_3, window_bounds = array<i64: 4, 1>}, {pipeline_mode = #tpu.pipeline_mode<synchronous>, transform_indices = @transform_4, window_bounds = array<i64: 2, 2>}, {pipeline_mode = #tpu.pipeline_mode<synchronous>, transform_indices = @transform_5, window_bounds = array<i64: 2, 2>}, {pipeline_mode = #tpu.pipeline_mode<synchronous>, transform_indices = @transform_6, window_bounds = array<i64: 1, 2>}, {pipeline_mode = #tpu.pipeline_mode<synchronous>, transform_indices = @transform_7, window_bounds = array<i64: 8, 128>}, {pipeline_mode = #tpu.pipeline_mode<synchronous>, transform_indices = @transform_8, window_bounds = array<i64: 4, 128>}]} {
    %c0_i32 = arith.constant 0 : i32
    %0 = arith.cmpi eq, %arg0, %c0_i32 : i32
    %c0_i32_0 = arith.constant 0 : i32
    %1 = arith.cmpi eq, %arg1, %c0_i32_0 : i32
    %2 = arith.andi %0, %1 : i1
    %3 = arith.extui %2 : i1 to i32
    %c0_i32_1 = arith.constant 0 : i32
    %4 = arith.cmpi ne, %3, %c0_i32_1 : i32
    scf.if %4 {
      %cst_25 = arith.constant 0.000000e+00 : f32
      %46 = vector.broadcast %cst_25 : f32 to vector<4x1xf32>
      %c0_26 = arith.constant 0 : index
      %c0_27 = arith.constant 0 : index
      %47 = vector.load %arg11[%c0_26, %c0_27] : memref<4x1xf32, #tpu.memory_space<vmem>>, vector<4x1xf32>
      tpu.vector_store %arg11[%c0_26, %c0_27], %46 {strides = array<i32>} : memref<4x1xf32, #tpu.memory_space<vmem>>, vector<4x1xf32>,
      %cst_28 = arith.constant 0.000000e+00 : f32
      %48 = vector.broadcast %cst_28 : f32 to vector<4x1xf32>
      %c0_29 = arith.constant 0 : index
      %c0_30 = arith.constant 0 : index
      %49 = vector.load %arg12[%c0_29, %c0_30] : memref<4x1xf32, #tpu.memory_space<vmem>>, vector<4x1xf32>
      tpu.vector_store %arg12[%c0_29, %c0_30], %48 {strides = array<i32>} : memref<4x1xf32, #tpu.memory_space<vmem>>, vector<4x1xf32>,
      %cst_31 = arith.constant 0.000000e+00 : f32
      %50 = vector.broadcast %cst_31 : f32 to vector<4x1xf32>
      %c0_32 = arith.constant 0 : index
      %c0_33 = arith.constant 0 : index
      %51 = vector.load %arg13[%c0_32, %c0_33] : memref<4x1xf32, #tpu.memory_space<vmem>>, vector<4x1xf32>
      tpu.vector_store %arg13[%c0_32, %c0_33], %50 {strides = array<i32>} : memref<4x1xf32, #tpu.memory_space<vmem>>, vector<4x1xf32>,
    } else {
    }
    %c0 = arith.constant 0 : index
    %c0_2 = arith.constant 0 : index
    %c0_3 = arith.constant 0 : index
    %5 = vector.load %arg3[%c0, %c0_2, %c0_3] : memref<1x4x256xbf16, #tpu.memory_space<vmem>>, vector<1x4x256xbf16>
    %6 = vector.shape_cast %5 : vector<1x4x256xbf16> to vector<4x256xbf16>
    %7 = arith.extf %6 : vector<4x256xbf16> to vector<4x256xf32>
    %c0_4 = arith.constant 0 : index
    %c0_5 = arith.constant 0 : index
    %c0_6 = arith.constant 0 : index
    %8 = vector.load %arg4[%c0_4, %c0_5, %c0_6] : memref<1x1x256xi32, #tpu.memory_space<vmem>>, vector<1x1x256xi32>
    %9 = vector.shape_cast %8 : vector<1x1x256xi32> to vector<1x256xi32>
    %10 = tpu.iota {dimensions = array<i32: 0>} : vector<4x256xi32>
    %11 = vector.broadcast %9 : vector<1x256xi32> to vector<4x256xi32>
    %12 = arith.cmpi eq, %10, %11 : vector<4x256xi32>
    %13 = arith.extui %12 : vector<4x256xi1> to vector<4x256xi32>
    %14 = arith.sitofp %13 : vector<4x256xi32> to vector<4x256xf32>
    %cst = arith.constant dense<0xFF800000> : vector<256xf32>
    %15 = vector.multi_reduction <maximumf>, %7, %cst [0] : vector<4x256xf32> to vector<256xf32>
    %16 = vector.shape_cast %15 : vector<256xf32> to vector<1x256xf32>
    %17 = vector.broadcast %16 : vector<1x256xf32> to vector<4x256xf32>
    %18 = arith.subf %7, %17 : vector<4x256xf32>
    %19 = math.exp %18 : vector<4x256xf32>
    %cst_7 = arith.constant dense<0.000000e+00> : vector<256xf32>
    %20 = vector.multi_reduction <add>, %19, %cst_7 [0] : vector<4x256xf32> to vector<256xf32>
    %21 = vector.shape_cast %20 : vector<256xf32> to vector<1x256xf32>
    %22 = tpu.reciprocal %21 {approx = true} : vector<1x256xf32> -> vector<1x256xf32>
    %23 = vector.broadcast %22 : vector<1x256xf32> to vector<4x256xf32>
    %24 = arith.mulf %19, %23 : vector<4x256xf32>
    %c0_8 = arith.constant 0 : index
    %c0_9 = arith.constant 0 : index
    %25 = vector.load %arg11[%c0_8, %c0_9] : memref<4x1xf32, #tpu.memory_space<vmem>>, vector<4x1xf32>
    %26 = arith.mulf %24, %14 : vector<4x256xf32>
    %cst_10 = arith.constant dense<0.000000e+00> : vector<4xf32>
    %27 = vector.multi_reduction <add>, %26, %cst_10 [1] : vector<4x256xf32> to vector<4xf32>
    %28 = vector.shape_cast %27 : vector<4xf32> to vector<4x1xf32>
    %29 = arith.addf %25, %28 : vector<4x1xf32>
    %c0_11 = arith.constant 0 : index
    %c0_12 = arith.constant 0 : index
    %30 = vector.load %arg11[%c0_11, %c0_12] : memref<4x1xf32, #tpu.memory_space<vmem>>, vector<4x1xf32>
    tpu.vector_store %arg11[%c0_11, %c0_12], %29 {strides = array<i32>} : memref<4x1xf32, #tpu.memory_space<vmem>>, vector<4x1xf32>,
    %c0_13 = arith.constant 0 : index
    %c0_14 = arith.constant 0 : index
    %31 = vector.load %arg12[%c0_13, %c0_14] : memref<4x1xf32, #tpu.memory_space<vmem>>, vector<4x1xf32>
    %cst_15 = arith.constant dense<0.000000e+00> : vector<4xf32>
    %32 = vector.multi_reduction <add>, %24, %cst_15 [1] : vector<4x256xf32> to vector<4xf32>
    %33 = vector.shape_cast %32 : vector<4xf32> to vector<4x1xf32>
    %34 = arith.addf %31, %33 : vector<4x1xf32>
    %c0_16 = arith.constant 0 : index
    %c0_17 = arith.constant 0 : index
    %35 = vector.load %arg12[%c0_16, %c0_17] : memref<4x1xf32, #tpu.memory_space<vmem>>, vector<4x1xf32>
    tpu.vector_store %arg12[%c0_16, %c0_17], %34 {strides = array<i32>} : memref<4x1xf32, #tpu.memory_space<vmem>>, vector<4x1xf32>,
    %c0_18 = arith.constant 0 : index
    %c0_19 = arith.constant 0 : index
    %36 = vector.load %arg13[%c0_18, %c0_19] : memref<4x1xf32, #tpu.memory_space<vmem>>, vector<4x1xf32>
    %cst_20 = arith.constant dense<0.000000e+00> : vector<4xf32>
    %37 = vector.multi_reduction <add>, %14, %cst_20 [1] : vector<4x256xf32> to vector<4xf32>
    %38 = vector.shape_cast %37 : vector<4xf32> to vector<4x1xf32>
    %39 = arith.addf %36, %38 : vector<4x1xf32>
    %c0_21 = arith.constant 0 : index
    %c0_22 = arith.constant 0 : index
    %40 = vector.load %arg13[%c0_21, %c0_22] : memref<4x1xf32, #tpu.memory_space<vmem>>, vector<4x1xf32>
    tpu.vector_store %arg13[%c0_21, %c0_22], %39 {strides = array<i32>} : memref<4x1xf32, #tpu.memory_space<vmem>>, vector<4x1xf32>,
    %c1_i32 = arith.constant 1 : i32
    %41 = arith.cmpi eq, %arg0, %c1_i32 : i32
    %c0_i32_23 = arith.constant 0 : i32
    %42 = arith.cmpi eq, %arg1, %c0_i32_23 : i32
    %43 = arith.andi %41, %42 : i1
    %44 = arith.extui %43 : i1 to i32
    %c0_i32_24 = arith.constant 0 : i32
    %45 = arith.cmpi ne, %44, %c0_i32_24 : i32
    scf.if %45 {
      %c0_25 = arith.constant 0 : index
      %c0_26 = arith.constant 0 : index
      %46 = vector.load %arg11[%c0_25, %c0_26] : memref<4x1xf32, #tpu.memory_space<vmem>>, vector<4x1xf32>
      %c0_27 = arith.constant 0 : index
      %c0_28 = arith.constant 0 : index
      %47 = vector.load %arg12[%c0_27, %c0_28] : memref<4x1xf32, #tpu.memory_space<vmem>>, vector<4x1xf32>
      %c0_29 = arith.constant 0 : index
      %c0_30 = arith.constant 0 : index
      %48 = vector.load %arg13[%c0_29, %c0_30] : memref<4x1xf32, #tpu.memory_space<vmem>>, vector<4x1xf32>
      %cst_31 = arith.constant 2.000000e+00 : f32
      %49 = vector.broadcast %cst_31 : f32 to vector<4x1xf32>
      %50 = arith.mulf %49, %46 : vector<4x1xf32>
      %cst_32 = arith.constant 9.99999974E-6 : f32
      %51 = vector.broadcast %cst_32 : f32 to vector<4x1xf32>
      %52 = arith.addf %50, %51 : vector<4x1xf32>
      %53 = arith.addf %47, %48 : vector<4x1xf32>
      %cst_33 = arith.constant 9.99999974E-6 : f32
      %54 = vector.broadcast %cst_33 : f32 to vector<4x1xf32>
      %55 = arith.addf %53, %54 : vector<4x1xf32>
      %56 = arith.divf %52, %55 : vector<4x1xf32>
      %cst_34 = arith.constant 9.99999974E-6 : f32
      %57 = vector.broadcast %cst_34 : f32 to vector<4x1xf32>
      %58 = arith.addf %46, %57 : vector<4x1xf32>
      %59 = arith.addf %47, %48 : vector<4x1xf32>
      %60 = arith.subf %59, %46 : vector<4x1xf32>
      %cst_35 = arith.constant 9.99999974E-6 : f32
      %61 = vector.broadcast %cst_35 : f32 to vector<4x1xf32>
      %62 = arith.addf %60, %61 : vector<4x1xf32>
      %63 = arith.divf %58, %62 : vector<4x1xf32>
      %64 = vector.shape_cast %63 : vector<4x1xf32> to vector<1x4x1xf32>
      %cst_36 = arith.constant dense<0.000000e+00> : vector<1xf32>
      %65 = vector.multi_reduction <add>, %64, %cst_36 [1, 2] : vector<1x4x1xf32> to vector<1xf32>
      %66 = vector.shape_cast %65 : vector<1xf32> to vector<1x1x1xf32>
      %67 = vector.extract %66[0, 0, 0] : f32 from vector<1x1x1xf32>
      %68 = vector.broadcast %67 : f32 to vector<1x1xf32>
      %cst_37 = arith.constant 4.000000e+00 : f32
      %69 = vector.broadcast %cst_37 : f32 to vector<1x1xf32>
      %70 = arith.divf %68, %69 : vector<1x1xf32>
      %c0_38 = arith.constant 0 : index
      %c0_39 = arith.constant 0 : index
      %71 = vector.load %arg5[%c0_38, %c0_39] : memref<4x1xf32, #tpu.memory_space<vmem>>, vector<4x1xf32>
      %cst_40 = arith.constant 1.000000e+00 : f32
      %72 = vector.broadcast %cst_40 : f32 to vector<4x1xf32>
      %73 = arith.subf %72, %56 : vector<4x1xf32>
      %74 = arith.mulf %71, %73 : vector<4x1xf32>
      %75 = vector.shape_cast %74 : vector<4x1xf32> to vector<1x4x1xf32>
      %cst_41 = arith.constant dense<0.000000e+00> : vector<1xf32>
      %76 = vector.multi_reduction <add>, %75, %cst_41 [1, 2] : vector<1x4x1xf32> to vector<1xf32>
      %77 = vector.shape_cast %76 : vector<1xf32> to vector<1x1x1xf32>
      %78 = vector.extract %77[0, 0, 0] : f32 from vector<1x1x1xf32>
      %79 = vector.broadcast %78 : f32 to vector<1x1xf32>
      %c0_42 = arith.constant 0 : index
      %c0_43 = arith.constant 0 : index
      %80 = vector.load %arg6[%c0_42, %c0_43] : memref<2x2xf32, #tpu.memory_space<vmem>>, vector<2x2xf32>
      %c0_44 = arith.constant 0 : index
      %c0_45 = arith.constant 0 : index
      %81 = vector.load %arg7[%c0_44, %c0_45] : memref<2x2xf32, #tpu.memory_space<vmem>>, vector<2x2xf32>
      %c0_46 = arith.constant 0 : index
      %c0_47 = arith.constant 0 : index
      %82 = vector.load %arg8[%c0_46, %c0_47] : memref<1x2xf32, #tpu.memory_space<vmem>>, vector<1x2xf32>
      %cst_48 = arith.constant dense<0xFF800000> : vector<2xf32>
      %83 = vector.multi_reduction <maximumf>, %80, %cst_48 [1] : vector<2x2xf32> to vector<2xf32>
      %84 = vector.shape_cast %83 : vector<2xf32> to vector<2x1xf32>
      %85 = vector.broadcast %84 : vector<2x1xf32> to vector<2x2xf32>
      %86 = arith.subf %80, %85 : vector<2x2xf32>
      %87 = math.exp %86 : vector<2x2xf32>
      %88 = vector.broadcast %84 : vector<2x1xf32> to vector<2x2xf32>
      %89 = arith.subf %80, %88 : vector<2x2xf32>
      %cst_49 = arith.constant dense<0.000000e+00> : vector<2xf32>
      %90 = vector.multi_reduction <add>, %87, %cst_49 [1] : vector<2x2xf32> to vector<2xf32>
      %91 = vector.shape_cast %90 : vector<2xf32> to vector<2x1xf32>
      %92 = math.log %91 : vector<2x1xf32>
      %93 = vector.broadcast %92 : vector<2x1xf32> to vector<2x2xf32>
      %94 = arith.subf %89, %93 : vector<2x2xf32>
      %95 = arith.mulf %81, %94 : vector<2x2xf32>
      %cst_50 = arith.constant dense<0.000000e+00> : vector<2xf32>
      %96 = vector.multi_reduction <add>, %95, %cst_50 [1] : vector<2x2xf32> to vector<2xf32>
      %97 = vector.shape_cast %96 : vector<2xf32> to vector<2x1xf32>
      %cst_51 = arith.constant 0.000000e+00 : f32
      %98 = vector.broadcast %cst_51 : f32 to vector<2x1xf32>
      %99 = arith.subf %98, %97 : vector<2x1xf32>
      %100 = vector.broadcast %82 : vector<1x2xf32> to vector<2x2xf32>
      %101 = arith.mulf %81, %100 : vector<2x2xf32>
      %cst_52 = arith.constant dense<0.000000e+00> : vector<2xf32>
      %102 = vector.multi_reduction <add>, %101, %cst_52 [1] : vector<2x2xf32> to vector<2xf32>
      %103 = vector.shape_cast %102 : vector<2xf32> to vector<2x1xf32>
      %104 = arith.mulf %103, %99 : vector<2x1xf32>
      %105 = vector.shape_cast %104 : vector<2x1xf32> to vector<1x2x1xf32>
      %cst_53 = arith.constant dense<0.000000e+00> : vector<1xf32>
      %106 = vector.multi_reduction <add>, %105, %cst_53 [1, 2] : vector<1x2x1xf32> to vector<1xf32>
      %107 = vector.shape_cast %106 : vector<1xf32> to vector<1x1x1xf32>
      %108 = vector.extract %107[0, 0, 0] : f32 from vector<1x1x1xf32>
      %109 = vector.broadcast %108 : f32 to vector<1x1xf32>
      %110 = vector.shape_cast %103 : vector<2x1xf32> to vector<1x2x1xf32>
      %cst_54 = arith.constant dense<0.000000e+00> : vector<1xf32>
      %111 = vector.multi_reduction <add>, %110, %cst_54 [1, 2] : vector<1x2x1xf32> to vector<1xf32>
      %112 = vector.shape_cast %111 : vector<1xf32> to vector<1x1x1xf32>
      %113 = vector.extract %112[0, 0, 0] : f32 from vector<1x1x1xf32>
      %114 = vector.broadcast %113 : f32 to vector<1x1xf32>
      %115 = arith.divf %109, %114 : vector<1x1xf32>
      %c0_55 = arith.constant 0 : index
      %116 = memref.load %arg2[%c0_55] : memref<2xf32, #tpu.memory_space<smem>>
      %117 = vector.broadcast %116 : f32 to vector<1x1xf32>
      %c1 = arith.constant 1 : index
      %118 = memref.load %arg2[%c1] : memref<2xf32, #tpu.memory_space<smem>>
      %119 = vector.broadcast %118 : f32 to vector<1x1xf32>
      %cst_56 = arith.constant 5.000000e-01 : f32
      %120 = vector.broadcast %cst_56 : f32 to vector<1x1xf32>
      %121 = arith.mulf %120, %117 : vector<1x1xf32>
      %122 = math.exp %121 : vector<1x1xf32>
      %cst_57 = arith.constant 5.000000e-01 : f32
      %123 = vector.broadcast %cst_57 : f32 to vector<1x1xf32>
      %124 = arith.mulf %123, %119 : vector<1x1xf32>
      %125 = math.exp %124 : vector<1x1xf32>
      %cst_58 = arith.constant 0.000000e+00 : f32
      %126 = vector.broadcast %cst_58 : f32 to vector<1x1xf32>
      %127 = arith.subf %126, %117 : vector<1x1xf32>
      %128 = math.exp %127 : vector<1x1xf32>
      %cst_59 = arith.constant 5.000000e-01 : f32
      %129 = vector.broadcast %cst_59 : f32 to vector<1x1xf32>
      %130 = arith.mulf %129, %128 : vector<1x1xf32>
      %131 = arith.mulf %130, %79 : vector<1x1xf32>
      %132 = arith.addf %131, %117 : vector<1x1xf32>
      %cst_60 = arith.constant 0.000000e+00 : f32
      %133 = vector.broadcast %cst_60 : f32 to vector<1x1xf32>
      %134 = arith.subf %133, %119 : vector<1x1xf32>
      %135 = math.exp %134 : vector<1x1xf32>
      %cst_61 = arith.constant 5.000000e-01 : f32
      %136 = vector.broadcast %cst_61 : f32 to vector<1x1xf32>
      %137 = arith.mulf %136, %135 : vector<1x1xf32>
      %138 = arith.mulf %137, %115 : vector<1x1xf32>
      %139 = arith.addf %138, %119 : vector<1x1xf32>
      %140 = arith.addf %132, %139 : vector<1x1xf32>
      %141 = tpu.iota {dimensions = array<i32: 0>} : vector<8x128xi32>
      %c0_i32_62 = arith.constant 0 : i32
      %142 = vector.broadcast %c0_i32_62 : i32 to vector<8x128xi32>
      %143 = arith.cmpi eq, %141, %142 : vector<8x128xi32>
      %cst_63 = arith.constant 0.000000e+00 : f32
      %144 = vector.shape_cast %140 : vector<1x1xf32> to vector<1x1xf32>
      %145 = vector.broadcast %144 : vector<1x1xf32> to vector<8x128xf32>
      %146 = vector.broadcast %cst_63 : f32 to vector<8x128xf32>
      %147 = arith.select %143, %145, %146 : vector<8x128xi1>, vector<8x128xf32>
      %c1_i32_64 = arith.constant 1 : i32
      %148 = vector.broadcast %c1_i32_64 : i32 to vector<8x128xi32>
      %149 = arith.cmpi eq, %141, %148 : vector<8x128xi32>
      %cst_65 = arith.constant 0.000000e+00 : f32
      %150 = vector.shape_cast %79 : vector<1x1xf32> to vector<1x1xf32>
      %151 = vector.broadcast %150 : vector<1x1xf32> to vector<8x128xf32>
      %152 = vector.broadcast %cst_65 : f32 to vector<8x128xf32>
      %153 = arith.select %149, %151, %152 : vector<8x128xi1>, vector<8x128xf32>
      %154 = arith.addf %147, %153 : vector<8x128xf32>
      %c2_i32 = arith.constant 2 : i32
      %155 = vector.broadcast %c2_i32 : i32 to vector<8x128xi32>
      %156 = arith.cmpi eq, %141, %155 : vector<8x128xi32>
      %cst_66 = arith.constant 0.000000e+00 : f32
      %157 = vector.shape_cast %115 : vector<1x1xf32> to vector<1x1xf32>
      %158 = vector.broadcast %157 : vector<1x1xf32> to vector<8x128xf32>
      %159 = vector.broadcast %cst_66 : f32 to vector<8x128xf32>
      %160 = arith.select %156, %158, %159 : vector<8x128xi1>, vector<8x128xf32>
      %161 = arith.addf %154, %160 : vector<8x128xf32>
      %c3_i32 = arith.constant 3 : i32
      %162 = vector.broadcast %c3_i32 : i32 to vector<8x128xi32>
      %163 = arith.cmpi eq, %141, %162 : vector<8x128xi32>
      %cst_67 = arith.constant 0.000000e+00 : f32
      %164 = vector.shape_cast %70 : vector<1x1xf32> to vector<1x1xf32>
      %165 = vector.broadcast %164 : vector<1x1xf32> to vector<8x128xf32>
      %166 = vector.broadcast %cst_67 : f32 to vector<8x128xf32>
      %167 = arith.select %163, %165, %166 : vector<8x128xi1>, vector<8x128xf32>
      %168 = arith.addf %161, %167 : vector<8x128xf32>
      %c4_i32 = arith.constant 4 : i32
      %169 = vector.broadcast %c4_i32 : i32 to vector<8x128xi32>
      %170 = arith.cmpi eq, %141, %169 : vector<8x128xi32>
      %cst_68 = arith.constant 0.000000e+00 : f32
      %171 = vector.shape_cast %122 : vector<1x1xf32> to vector<1x1xf32>
      %172 = vector.broadcast %171 : vector<1x1xf32> to vector<8x128xf32>
      %173 = vector.broadcast %cst_68 : f32 to vector<8x128xf32>
      %174 = arith.select %170, %172, %173 : vector<8x128xi1>, vector<8x128xf32>
      %175 = arith.addf %168, %174 : vector<8x128xf32>
      %c5_i32 = arith.constant 5 : i32
      %176 = vector.broadcast %c5_i32 : i32 to vector<8x128xi32>
      %177 = arith.cmpi eq, %141, %176 : vector<8x128xi32>
      %cst_69 = arith.constant 0.000000e+00 : f32
      %178 = vector.shape_cast %125 : vector<1x1xf32> to vector<1x1xf32>
      %179 = vector.broadcast %178 : vector<1x1xf32> to vector<8x128xf32>
      %180 = vector.broadcast %cst_69 : f32 to vector<8x128xf32>
      %181 = arith.select %177, %179, %180 : vector<8x128xi1>, vector<8x128xf32>
      %182 = arith.addf %175, %181 : vector<8x128xf32>
      %c0_70 = arith.constant 0 : index
      %c0_71 = arith.constant 0 : index
      %183 = vector.load %arg9[%c0_70, %c0_71] : memref<8x128xf32, #tpu.memory_space<vmem>>, vector<8x128xf32>
      tpu.vector_store %arg9[%c0_70, %c0_71], %182 {strides = array<i32>} : memref<8x128xf32, #tpu.memory_space<vmem>>, vector<8x128xf32>,
      %184 = vector.shape_cast %56 : vector<4x1xf32> to vector<4x1xf32>
      %185 = vector.broadcast %184 : vector<4x1xf32> to vector<4x128xf32>
      %c0_72 = arith.constant 0 : index
      %c0_73 = arith.constant 0 : index
      %186 = vector.load %arg10[%c0_72, %c0_73] : memref<4x128xf32, #tpu.memory_space<vmem>>, vector<4x128xf32>
      tpu.vector_store %arg10[%c0_72, %c0_73], %185 {strides = array<i32>} : memref<4x128xf32, #tpu.memory_space<vmem>>, vector<4x128xf32>,
    } else {
    }
    return
  }
  func.func @transform_0(%arg0: i32, %arg1: i32) -> i32 {
    %c0_i32 = arith.constant 0 : i32
    %c0_i32_0 = arith.constant 0 : i32
    return %c0_i32 : i32
  }
  func.func @transform_1(%arg0: i32, %arg1: i32) -> (i32, i32, i32) {
    %c0_i32 = arith.constant 0 : i32
    %c0_i32_0 = arith.constant 0 : i32
    return %arg0, %c0_i32, %arg1 : i32, i32, i32
  }
  func.func @transform_2(%arg0: i32, %arg1: i32) -> (i32, i32, i32) {
    %c0_i32 = arith.constant 0 : i32
    %c0_i32_0 = arith.constant 0 : i32
    return %arg0, %c0_i32, %arg1 : i32, i32, i32
  }
  func.func @transform_3(%arg0: i32, %arg1: i32) -> (i32, i32) {
    %c0_i32 = arith.constant 0 : i32
    %c0_i32_0 = arith.constant 0 : i32
    %c0_i32_1 = arith.constant 0 : i32
    return %c0_i32, %c0_i32_0 : i32, i32
  }
  func.func @transform_4(%arg0: i32, %arg1: i32) -> (i32, i32) {
    %c0_i32 = arith.constant 0 : i32
    %c0_i32_0 = arith.constant 0 : i32
    %c0_i32_1 = arith.constant 0 : i32
    return %c0_i32, %c0_i32_0 : i32, i32
  }
  func.func @transform_5(%arg0: i32, %arg1: i32) -> (i32, i32) {
    %c0_i32 = arith.constant 0 : i32
    %c0_i32_0 = arith.constant 0 : i32
    %c0_i32_1 = arith.constant 0 : i32
    return %c0_i32, %c0_i32_0 : i32, i32
  }
  func.func @transform_6(%arg0: i32, %arg1: i32) -> (i32, i32) {
    %c0_i32 = arith.constant 0 : i32
    %c0_i32_0 = arith.constant 0 : i32
    %c0_i32_1 = arith.constant 0 : i32
    return %c0_i32, %c0_i32_0 : i32, i32
  }
  func.func @transform_7(%arg0: i32, %arg1: i32) -> (i32, i32) {
    %c0_i32 = arith.constant 0 : i32
    %c0_i32_0 = arith.constant 0 : i32
    %c0_i32_1 = arith.constant 0 : i32
    return %c0_i32, %c0_i32_0 : i32, i32
  }
  func.func @transform_8(%arg0: i32, %arg1: i32) -> (i32, i32) {
    %c0_i32 = arith.constant 0 : i32
    %c0_i32_0 = arith.constant 0 : i32
    %c0_i32_1 = arith.constant 0 : i32
    return %c0_i32, %c0_i32_0 : i32, i32
  }
}

</mosaic_0001>

<bundles_post_ra>
// kernel: automatic_weighted_loss2.1
= control target key start
LH: loop header
LB: loop body
LE: loop exit
PB: predicated region body
PF: predicated region fallthrough
CT: control target
= control target key end

     0   :  { %14 = vsyncpa [#allocation6], 0  ;;  %s887_s27 = smov 0   ;;  %s889_s28 = smov 0   ;;  %s1002_s0 = inlined_call_operand.vmem [shape: f32[2], index: 0, kind: input, shape index: {}]   ;;  %s1003_s1 = inlined_call_operand.vmem [shape: bf16[2,4,256], index: 1, kind: input, shape index: {}]   ;;  %s1004_s2 = inlined_call_operand.vmem [shape: s32[2,1,256], index: 2, kind: input, shape index: {}]   ;;  %s1005_s3 = inlined_call_operand.vmem [shape: f32[4,1], index: 3, kind: input, shape index: {}]   ;;  %s1006_s4 = inlined_call_operand.vmem [shape: f32[2,2], index: 4, kind: input, shape index: {}]   ;;  %s1007_s5 = inlined_call_operand.vmem [shape: f32[2,2], index: 5, kind: input, shape index: {}]   ;;  %s1008_s6 = inlined_call_operand.vmem [shape: f32[1,2], index: 6, kind: input, shape index: {}]   ;;  %s1009_s7 = inlined_call_operand.vmem [shape: f32[8,128], index: 7, kind: output, shape index: {0}]   ;;  %s1010_s8 = inlined_call_operand.vmem [shape: f32[4,128], index: 8, kind: output, shape index: {1}]  }
   0x1   :  { %s891_s29 = smov 0  }
   0x2 LB: > { %s704_s30 = sadd.s32 4294967295, %s836_s29   ;;  %s32_s9 = sadd.s32 1, %s832_s28  ;;  %s836_s29 = sphi %s891_s29, %s20_s29   ;;  %s832_s28 = sphi %s889_s28, %s1014_s28   ;;  %s828_s27 = sphi %s887_s27, %s1013_s27  }
   0x3   : > { %p34_p0 = scmp.ge.s32.totalorder %s32_s9, 2  ;;  %p705_p1 = scmp.ge.s32.totalorder %s836_s29, 1 }
   0x4   : > { %p240_p2 = scmp.lt.s32.totalorder %s836_s29, 3  ;;  %p912_p4 = scmp.eq.s32.totalorder %s704_s30, 0 }
   0x5   : > { %s1016_s9 = smov (%p34_p0, %s32_s9), 0  ;;  %s253_s14 = sshll.u32 %s1002_s0, 4  ;;  %s254_s14 = int_to_ptr.vmem [resolvable:$true] %s253_s14 }
   0x6   : > { %p908_p3 = pnand %p705_p1, %p240_p2  ;;  %s795_s15 = scalar_lea.vmem %s254_s14, 16 }
   0x7   : > { %p796_p7 = scmp.ne.s32.totalorder %s254_s14, %s795_s15  ;;  %p803_p11 = scmp.lt.s32.totalorder %s254_s14, %s254_s14 }
   0x8   : > { %p736_p5 = pneg %p908_p3  ;;  %p804_p12 = scmp.lt.s32.totalorder %s795_s15, %s795_s15 }
   0xa   : > { %p737_p6 = pnand %p912_p4, %p736_p5  ;;  %p805_p13 = por %p804_p12, %p803_p11 }
   0xc   : > { %p797_p8 = pneg %p737_p6 }
   0xe   : > { %p798_p9 = pnand %p797_p8, %p796_p7 }
  0x10   : > { %p799_p10 = pneg %p798_p9 }
  0x12   : > { %p806_p0 = pnand %p805_p13, %p799_p10 }
  0x14   : > { %809 = shalt.err (!%p806_p0)
}
  0x15   : > { %s838_s16 = smov [#allocation5]   ;;  %303 = sbr.rel (%p908_p3) target bundleno = 820 (0x334), region = 48 }
  0x16   : > { %739 = dma.vmem_to_smem (!%p737_p6), %s254_s14, 16, %s838_s16, [#allocation6]  }
  0x1a   : > { %823 = dma.done.wait (%p912_p4), [#allocation6], 16  }
  0x1b   : > { %825 = vsyncadd (%p912_p4), [#allocation6], 4294967280 }
  0x1c   : > { %309 = sfence }
  0x1d   : > { %p346_p1 = scmp.lt.s32.totalorder %s828_s27, 1  ;;  %p364_p2 = scmp.eq.s32.totalorder %s828_s27, 0 }
  0x1e   : > { %vm370_vm0 = vcmask (%p364_p2), 3072   ;;  %v839_v0 = vmov (%p364_p2), 0.0  }
  0x1f   : > { %s347_s17 = scalar_select %p346_p1, %s828_s27, 1  ;;  %371 = vst.msk [vmem:[#allocation2] sm:$0xf] (%p364_p2), %vm370_vm0, %v839_v0  ;;  %372 = vst.msk [vmem:[#allocation3] sm:$0xf] (%p364_p2), %vm370_vm0, %v839_v0 }
  0x20   : > { %369 = sbr.rel (!%p364_p2) target bundleno = 37 (0x25), region = 56  ;;  %373 = vst.msk [vmem:[#allocation4] sm:$0xf] (%p364_p2), %vm370_vm0, %v839_v0 }
  0x21   : > { %s721_s18 = sshll.u32 %s347_s17, 2  ;;  %s712_s19 = sshll.u32 %s347_s17, 1 }
  0x22   : > { %s353_s22 = scalar_lea.vmem %s1003_s1, %s721_s18  ;;  %s362_s25 = scalar_lea.vmem %s1004_s2, %s712_s19 }
  0x25 PF: > { %v374_v1 = vld [vmem:[%s353_s22] sm:$0xf]  ;;  %v377_v2 = vlaneseq  ;;  %vm396_vm1 = vcmask 1043456   ;;  %v840_v18 = vmov 0.0   ;;  %p478_p3 = scmp.eq.s32.totalorder %s828_s27, 1  ;;  %vm457_vm4 = vcmask 3072  }
  0x26   : > { %v375_v3 = vunpack.c.l.bf16 %v374_v1  ;;  %v376_v5 = vld [vmem:[%s362_s25] sm:$0x3]  ;;  %vm527_vm5 = vcmask (%p478_p3), 9216   ;;  %vm556_vm6 = vcmask (%p478_p3), 1024   ;;  %s581_s17 = sld [smem:[#allocation5]] (%p478_p3) }
  0x27   : > { %v938_v4 = vshrl.u32 %v377_v2, 7  ;;  %v470_v0 = vld [vmem:[#allocation4] sm:$0xf]  ;;  %s718_s18 = sld [smem:[#allocation5 + $0x1]] (%p478_p3) }
  0x28   : > { %v394_v6 = vcombine.high %v375_v3, %v375_v3  ;;  %v397_v7 = vsel %vm396_vm1, %v375_v3, -inf }
  0x29   : > { %v381_v8 = vsub.s32 0, %v938_v4  ;;  %v385_v9 = vsub.s32 1, %v938_v4  ;;  %v398_v10 = vrot.slane %v397_v7, 4  ;;  %vm606_vm7 = vcmp.eq.s32.totalorder (%p478_p3), %v938_v4, 1 }
  0x2a   : > { %v404_v11 = vsel %vm396_vm1, %v394_v6, -inf  ;;  %vm604_vm8 = vcmp.eq.s32.totalorder (%p478_p3), %v938_v4, 0  ;;  %vm609_vm9 = vcmp.eq.s32.totalorder (%p478_p3), %v938_v4, 2  ;;  %vm612_vm10 = vcmp.eq.s32.totalorder (%p478_p3), %v938_v4, 3 }
  0x2b   : > { %v382_v12 = vrot.slane %v376_v5, %v381_v8  ;;  %v386_v13 = vrot.slane %v376_v5, %v385_v9  ;;  %v399_v14 = vmax.f32 %v397_v7, %v398_v10  ;;  %v405_v15 = vrot.slane %v404_v11, 4  ;;  %v459_v7 = vld [vmem:[#allocation3] sm:$0xf]  ;;  %v524_v10 = vld [vmem:[%s1006_s4] sm:$0x3] (%p478_p3) }
  0x2c   : > { %vm615_vm11 = vcmp.eq.s32.totalorder (%p478_p3), %v938_v4, 4  ;;  %vm618_vm12 = vcmp.eq.s32.totalorder (%p478_p3), %v938_v4, 5 }
  0x2d   : > { %vm387_vm2 = vcmp.eq.s32.totalorder %v938_v4, %v382_v12  ;;  %vm388_vm3 = vcmp.eq.s32.totalorder %v938_v4, %v386_v13  ;;  %v400_v16 = vrot.slane %v399_v14, 2  ;;  %v406_v17 = vmax.f32 %v404_v11, %v405_v15 }
  0x2e   : > { %v714_v19 = vsel %vm387_vm2, 1.0, %v840_v18  ;;  %v715_v20 = vsel %vm388_vm3, 1.0, %v840_v18  ;;  %v528_v11 = vsel (%p478_p3), %vm527_vm5, %v524_v10, -inf }
  0x2f   : > { %v401_v21 = vmax.f32 %v399_v14, %v400_v16  ;;  %v407_v22 = vrot.slane %v406_v17, 2  ;;  %v471_v23 = vsel %vm396_vm1, %v714_v19, 0.0  ;;  %v472_v24 = vsel %vm396_vm1, %v715_v20, 0.0 }
  0x30   : > { %v473_v27 = vadd.f32 %v472_v24, %v471_v23  ;;  %v445_v53 = vcombine.low %v714_v19, %v715_v20 }
  0x31   : > { %v402_v25 = vrot.slane %v401_v21, 1  ;;  %v408_v26 = vmax.f32 %v406_v17, %v407_v22 }
  0x32   : > { %474 = vadd.xlane.f32.xlu1 %v473_v27 }
  0x33   : > { %v403_v28 = vmax.f32 %v401_v21, %v402_v25  ;;  %v409_v29 = vrot.slane %v408_v26, 1 }
  0x35   : > { %v410_v30 = vmax.f32 %v408_v26, %v409_v29 }
  0x37   : > { %v413_v31 = vcombine.low %v403_v28, %v410_v30 }
  0x39   : > { %v415_v32 = vsub.f32 %v375_v3, %v413_v31  ;;  %v442_v3 = vld [vmem:[#allocation2] sm:$0xf] }
  0x3b   : > { %v416_v33 = vmul.f32 1.442695, %v415_v32 }
  0x3d   : > { %770 = vpow2.f32 %v416_v33 }
  0x4a   : > { %v771_v34 = vpop.eup %770 }
  0x4b   : > { %v419_v35 = vcombine.high %v771_v34, %v771_v34  ;;  %v421_v36 = vsel %vm396_vm1, %v771_v34, 0.0 }
  0x4c   : > { %v422_v37 = vrot.slane %v421_v36, 4 }
  0x4d   : > { %v428_v38 = vsel %vm396_vm1, %v419_v35, 0.0  ;;  %v525_v35 = vld [vmem:[%s1007_s5] sm:$0x3] (%p478_p3) }
  0x4e   : > { %v423_v39 = vadd.f32 %v422_v37, %v421_v36  ;;  %v429_v40 = vrot.slane %v428_v38, 4  ;;  %v717_v36 = vld [vmem:[%s1008_s6] ss:$0 sm:$0xff] (%p478_p3) }
  0x50   : > { %v424_v41 = vrot.slane %v423_v39, 2  ;;  %v430_v42 = vadd.f32 %v429_v40, %v428_v38 }
  0x52   : > { %v425_v43 = vadd.f32 %v424_v41, %v423_v39  ;;  %v431_v44 = vrot.slane %v430_v42, 2  ;;  %v551_v39 = vmul.f32 (%p478_p3), %v717_v36, %v525_v35  ;;  %v510_v41 = vld [vmem:[%s1005_s3] sm:$0xf] (%p478_p3) }
  0x54   : > { %v426_v45 = vrot.slane %v425_v43, 1  ;;  %v432_v46 = vadd.f32 %v431_v44, %v430_v42 }
  0x56   : > { %v427_v47 = vadd.f32 %v426_v45, %v425_v43  ;;  %v433_v48 = vrot.slane %v432_v46, 1  ;;  %v552_v43 = vsel (%p478_p3), %vm527_vm5, %v551_v39, 0.0 }
  0x58   : > { %v434_v49 = vadd.f32 %v433_v48, %v432_v46  ;;  %772 = vrcp.f32 %v427_v47  ;;  %v841_v46 = vmov (%p478_p3), 0  }
  0x59   : > { %776 = vset.pattern.permute.xlu0 (%p478_p3), %v841_v46 }
  0x5a   : > { %774 = vrcp.f32 %v434_v49 }
  0x65   : > { %v773_v50 = vpop.eup %772 }
  0x67   : > { %v775_v51 = vpop.eup %774 }
  0x68   : > { %v439_v52 = vcombine.low %v773_v50, %v775_v51 }
  0x6a   : > { %v441_v54 = vmul.f32 %v771_v34, %v439_v52 }
  0x6c   : > { %v447_v55 = vmul.f32 %v445_v53, %v441_v54  ;;  %v461_v56 = vcombine.high %v441_v54, %v441_v54  ;;  %v463_v60 = vsel %vm396_vm1, %v441_v54, 0.0 }
  0x6e   : > { %v449_v57 = vcombine.high %v447_v55, %v447_v55  ;;  %v451_v58 = vsel %vm396_vm1, %v447_v55, 0.0  ;;  %v464_v61 = vsel %vm396_vm1, %v461_v56, 0.0 }
  0x6f   : > { %v465_v63 = vadd.f32 %v464_v61, %v463_v60 }
  0x70   : > { %v452_v59 = vsel %vm396_vm1, %v449_v57, 0.0 }
  0x71   : > { %v453_v62 = vadd.f32 %v452_v59, %v451_v58 }
  0x73   : > { %454 = vadd.xlane.f32.xlu0 %v453_v62 }
  0x77   : > { %466 = vadd.xlane.f32.xlu0 %v465_v63 }
  0x7b   : > { %529 = vmax.xlane.f32.xlu0 (%p478_p3), %v528_v11 }
  0xbb   : > { %v475_v1 = vpop.xlane.xlu1 %474 }
  0xbc   : > { %v476_v2 = vadd.f32 %v475_v1, %v470_v0 }
  0xbe   : > { %477 = vst.msk [vmem:[#allocation4] sm:$0xf] %vm457_vm4, %v476_v2 }
  0xc5   : > { %v485_v19 = vld [vmem:[#allocation4] sm:$0xf] (%p478_p3) }
  0xfc   : > { %v455_v5 = vpop.xlane.xlu0 %454 }
  0xfd   : > { %v456_v6 = vadd.f32 %v455_v5, %v442_v3 }
  0xff   : > { %458 = vst.msk [vmem:[#allocation2] sm:$0xf] %vm457_vm4, %v456_v6  ;;  %482 = sbr.rel (!%p478_p3) target bundleno = 820 (0x334), region = 60 }
 0x100   : > { %v467_v8 = vpop.xlane.xlu0 %466 }
 0x101   : > { %v468_v9 = vadd.f32 %v467_v8, %v459_v7 }
 0x103   : > { %469 = vst.msk [vmem:[#allocation3] sm:$0xf] %vm457_vm4, %v468_v9 }
 0x104   : > { %v530_v12 = vpop.xlane.xlu0 %529 }
 0x105   : > { %v531_v13 = vsub.f32 %v524_v10, %v530_v12 }
 0x106   : > { %v483_v17 = vld [vmem:[#allocation2] sm:$0xf] }
 0x107   : > { %v532_v14 = vmul.f32 1.442695, %v531_v13  ;;  %v486_v24 = vmul.f32 2.0, %v483_v17  ;;  %v492_v26 = vadd.f32 1e-05, %v483_v17 }
 0x109   : > { %777 = vpow2.f32 %v532_v14  ;;  %v487_v25 = vadd.f32 1e-05, %v486_v24 }
 0x10a   : > { %v484_v18 = vld [vmem:[#allocation3] sm:$0xf] }
 0x10b   : > { %v488_v20 = vadd.f32 %v485_v19, %v484_v18  ;;  %v582_v19 = vstv %s581_s17 }
 0x10d   : > { %v489_v21 = vadd.f32 1e-05, %v488_v20  ;;  %v493_v22 = vsub.f32 %v488_v20, %v483_v17  ;;  %v584_v20 = vstv %s718_s18 }
 0x10f   : > { %779 = vrcp.f32 %v489_v21  ;;  %v494_v23 = vadd.f32 1e-05, %v493_v22  ;;  %v591_v21 = vsub.f32 0.0, %v582_v19  ;;  %v597_v22 = vsub.f32 0.0, %v584_v20 }
 0x111   : > { %781 = vrcp.f32 %v494_v23  ;;  %v592_v23 = vmul.f32 1.442695, %v591_v21  ;;  %v598_v24 = vmul.f32 1.442695, %v597_v22 }
 0x116   : > { %v778_v15 = vpop.eup %777 }
 0x117   : > { %v534_v16 = vsel %vm527_vm5, %v778_v15, 0.0 }
 0x118   : > { %535 = vadd.xlane.f32.xlu0 %v534_v16 }
 0x11c   : > { %v780_v27 = vpop.eup %779 }
 0x11d   : > { %v491_v28 = vmul.f32 %v780_v27, %v487_v25  ;;  %v588_v27 = vmul.f32 0.5, %v584_v20 }
 0x11e   : > { %v782_v29 = vpop.eup %781 }
 0x11f   : > { %v496_v30 = vmul.f32 %v782_v29, %v492_v26  ;;  %v511_v40 = vsub.f32 1.0, %v491_v28  ;;  %v585_v26 = vmul.f32 0.5, %v582_v19 }
 0x121   : > { %v497_v31 = vsel %vm457_vm4, %v496_v30, 0.0  ;;  %v512_v44 = vmul.f32 %v511_v40, %v510_v41  ;;  %v589_v30 = vmul.f32 1.442695, %v588_v27 }
 0x122   : > { %498 = vadd.xlane.f32.xlu0 %v497_v31 }
 0x123   : > { %v513_v45 = vsel %vm457_vm4, %v512_v44, 0.0 }
 0x1a1   : > { %v536_v32 = vpop.xlane.xlu0 %535 }
 0x1a2   : > { %783 = vlog2.f32 %v536_v32 }
 0x1a3   : > { %785 = vpow2.f32 %v592_v23 }
 0x1a4   : > { %787 = vpow2.f32 %v598_v24 }
 0x1ab   : > { %v499_v47 = vpop.xlane.xlu0 %498 }
 0x1ac   : > { %v500_v49 = vrot.slane %v499_v47, 4 }
 0x1ae   : > { %v501_v54 = vadd.f32 %v500_v49, %v499_v47 }
 0x1af   : > { %v784_v33 = vpop.eup %783 }
 0x1b0   : > { %v538_v34 = vmul.f32 0.6931472, %v784_v33  ;;  %v502_v58 = vrot.slane %v501_v54, 2  ;;  %v786_v29 = vpop.eup %785 }
 0x1b1   : > { %v788_v31 = vpop.eup %787  ;;  %v594_v32 = vmul.f32 0.5, %v786_v29 }
 0x1b2   : > { %v539_v37 = vsub.f32 %v531_v13, %v538_v34  ;;  %v503_v61 = vadd.f32 %v502_v58, %v501_v54  ;;  %v600_v34 = vmul.f32 0.5, %v788_v31 }
 0x1b4   : > { %v540_v38 = vmul.f32 %v539_v37, %v525_v35  ;;  %v504_v63 = vrot.slane %v503_v61, 1 }
 0x1b6   : > { %v541_v42 = vsel %vm527_vm5, %v540_v38, 0.0  ;;  %v505_v1 = vadd.f32 %v504_v63, %v503_v61 }
 0x1b7   : > { %542 = vadd.xlane.f32.xlu1 %v541_v42 }
 0x1b8   : > { %724 = vpush %v505_v1 }
 0x1bb   : > { %553 = vadd.xlane.f32.xlu1 %v552_v43 }
 0x1bf   : > { %514 = vadd.xlane.f32.xlu1 %v513_v45 }
 0x1e9   : > { %s981_s19 = spop %724 }
 0x1ea   : > { %v507_v42 = vstv %s981_s19 }
 0x1eb   : > { %v509_v44 = vmul.f32 0.25, %v507_v42 }
 0x240   : > { %v543_v48 = vpop.xlane.xlu1 %542 }
 0x241   : > { %v544_v50 = vsub.f32 0.0, %v543_v48 }
 0x244   : > { %v554_v51 = vpop.xlane.xlu1 %553 }
 0x245   : > { %v555_v52 = vmul.f32 %v554_v51, %v544_v50  ;;  %v568_v53 = vsel %vm556_vm6, %v554_v51, 0.0 }
 0x246   : > { %569 = vadd.xlane.f32.xlu1 %v568_v53 }
 0x247   : > { %v557_v55 = vsel %vm556_vm6, %v555_v52, 0.0  ;;  %v613_v52 = vsel %vm612_vm10, %v509_v44, 0.0 }
 0x248   : > { %558 = vadd.xlane.f32.xlu0 %v557_v55  ;;  %v515_v56 = vpop.xlane.xlu1 %514 }
 0x249   : > { %v516_v57 = vrot.slane %v515_v56, 4 }
 0x24b   : > { %v517_v59 = vadd.f32 %v516_v57, %v515_v56 }
 0x24d   : > { %v518_v60 = vrot.slane %v517_v59, 2 }
 0x24f   : > { %v519_v62 = vadd.f32 %v518_v60, %v517_v59 }
 0x251   : > { %v520_v0 = vrot.slane %v519_v62, 1 }
 0x253   : > { %v521_v2 = vadd.f32 %v520_v0, %v519_v62 }
 0x255   : > { %726 = vpush %v521_v2 }
 0x25e   : > { %624 = vperm.xlu0 %776, %v491_v28   ;;  %v586_v28 = vmul.f32 1.442695, %v585_v26 }
 0x286   : > { %s727_s20 = spop %726 }
 0x287   : > { %v523_v33 = vstv %s727_s20 }
 0x288   : > { %v595_v37 = vmul.f32 %v594_v32, %v523_v33  ;;  %v607_v45 = vsel %vm606_vm7, %v523_v33, 0.0 }
 0x28a   : > { %v596_v40 = vadd.f32 %v595_v37, %v582_v19 }
 0x2cf   : > { %v570_v3 = vpop.xlane.xlu1 %569 }
 0x2d0   : > { %v571_v5 = vrot.slane %v570_v3, 4 }
 0x2d1   : > { %v559_v6 = vpop.xlane.xlu0 %558 }
 0x2d2   : > { %v572_v7 = vadd.f32 %v571_v5, %v570_v3  ;;  %v560_v8 = vrot.slane %v559_v6, 4 }
 0x2d4   : > { %v573_v9 = vrot.slane %v572_v7, 2  ;;  %v561_v10 = vadd.f32 %v560_v8, %v559_v6 }
 0x2d6   : > { %v574_v11 = vadd.f32 %v573_v9, %v572_v7  ;;  %v562_v12 = vrot.slane %v561_v10, 2 }
 0x2d8   : > { %v563_v13 = vadd.f32 %v562_v12, %v561_v10  ;;  %v575_v14 = vrot.slane %v574_v11, 1 }
 0x2d9   : > { %v625_v15 = vpop.permute.xlu0 %624 }
 0x2da   : > { %v564_v16 = vrot.slane %v563_v13, 1  ;;  %627 = vst [vmem:[%s1010_s8] sm:$0xf] %v625_v15  ;;  %v576_v18 = vadd.f32 %v575_v14, %v574_v11 }
 0x2dc   : > { %v565_v17 = vadd.f32 %v564_v16, %v563_v13 }
 0x2de   : > { %728 = vpush %v565_v17 }
 0x2df   : > { %730 = vpush %v576_v18 }
 0x30f   : > { %s729_s21 = spop %728 }
 0x310   : > { %s731_s22 = spop %730  ;;  %v567_v36 = vstv %s729_s21 }
 0x311   : > { %v578_v25 = vstv %s731_s22 }
 0x312   : > { %789 = vrcp.f32 %v578_v25 }
 0x313   : > { %791 = vpow2.f32 %v586_v28 }
 0x314   : > { %793 = vpow2.f32 %v589_v30 }
 0x31f   : > { %v790_v35 = vpop.eup %789 }
 0x320   : > { %v580_v38 = vmul.f32 %v790_v35, %v567_v36  ;;  %v792_v47 = vpop.eup %791 }
 0x321   : > { %v794_v50 = vpop.eup %793  ;;  %v616_v53 = vsel %vm615_vm11, %v792_v47, 0.0 }
 0x322   : > { %v601_v39 = vmul.f32 %v600_v34, %v580_v38  ;;  %v610_v49 = vsel %vm609_vm9, %v580_v38, 0.0  ;;  %v619_v55 = vsel %vm618_vm12, %v794_v50, 0.0 }
 0x324   : > { %v602_v41 = vadd.f32 %v601_v39, %v584_v20 }
 0x326   : > { %v603_v43 = vadd.f32 %v602_v41, %v596_v40 }
 0x328   : > { %v605_v46 = vsel %vm604_vm8, %v603_v43, 0.0 }
 0x329   : > { %v608_v48 = vadd.f32 %v607_v45, %v605_v46 }
 0x32b   : > { %v611_v51 = vadd.f32 %v610_v49, %v608_v48 }
 0x32d   : > { %v614_v54 = vadd.f32 %v613_v52, %v611_v51 }
 0x32f   : > { %v617_v56 = vadd.f32 %v616_v53, %v614_v54 }
 0x331   : > { %v620_v57 = vadd.f32 %v619_v55, %v617_v56 }
 0x333   : > { %621 = vst [vmem:[%s1009_s7] sm:$0xff] %v620_v57 }
 0x334 PF: > { %s20_s29 = sadd.s32 1, %s836_s29   ;;  %s1013_s27 = smov %s832_s28 }
 0x335   : > { %p17_p4 = scmp.ge.s32.totalorder %s20_s29, 4   ;;  %s1014_s28 = smov %s1016_s9 }
 0x337   :  { %19 = sbr.rel (!%p17_p4) target bundleno = 2 (0x2), region = 98 }
 0x33c   :  { %645 = vsyncpa [#allocation6], 1 }
 0x33d   :  { %647 = vsyncpa [#allocation6 + $0x1], 1 }

</bundles_post_ra>
